<compile_context>
chip_gen: v7x
topology: tpu7x:2x2x1
jax: 0.10.0
libtpu: 0.0.40
codegen_flags: <defaults>
</compile_context>

<pallas_src>
import functools

import numpy as np

import jax
import jax.numpy as jnp
from jax.experimental import pallas as pl
from jax.experimental.pallas import tpu as pltpu  # noqa: F401  (kept for TPU-specific hooks)

_LANE = 128
_SUBLANE = 8


def _bridge_kernel(x_ref, w_ref, p_ref, mask_ref, o_ref, *,
                   kh, kw, w_in, eps, inv_n):
    # x_ref:    (CinP, NPI)  flat zero-padded input, column = (n*Hp + h)*W + w
    # w_ref:    (KH*KW, CoutP, CinP)   w3[ky*kw+kx, co, ci] = w[co, ci, ky, kx]
    # p_ref:    (CoutP, 2)   [:, 0] = gamma, [:, 1] = beta
    # mask_ref: (1, NPO)     1.0 on valid output columns, 0.0 on garbage/pad cols
    # o_ref:    (CoutP, NPO) lane-dense output
    c_out_p, npo = o_ref.shape

    # Conv as KH*KW shifted matmuls over the flat column axis (in-kernel im2col).
    conv = None
    for ky in range(kh):
        for kx in range(kw):
            off = ky * w_in + kx                       # static lane offset
            xs = x_ref[:, pl.ds(off, npo)]             # (CinP, NPO)
            term = jnp.dot(w_ref[ky * kw + kx], xs,
                           preferred_element_type=jnp.float32)
            conv = term if conv is None else conv + term

    # Training-mode BatchNorm stats in one pass (biased variance, eps=1e-5).
    # Garbage columns (h >= Ho or w >= Wo) are excluded by the static mask;
    # lane-padding columns are exactly zero so they contribute nothing.
    mask = mask_ref[...]                               # (1, NPO)
    cm = conv * mask
    s1 = jnp.sum(cm, axis=1, keepdims=True)            # (CoutP, 1)
    s2 = jnp.sum(cm * conv, axis=1, keepdims=True)
    mean = s1 * inv_n
    var = s2 * inv_n - mean * mean

    scale = p_ref[:, 0:1] * jax.lax.rsqrt(var + eps)   # gamma / sqrt(var+eps)
    shift = p_ref[:, 1:2] - mean * scale               # beta - mean*scale
    o_ref[...] = jnp.maximum(conv * scale + shift, 0.0)


@functools.partial(jax.jit, static_argnames=("eps",))
def down_unet_2d_bridge_block(x, w, b, gamma, beta, eps=1e-5):
    """x: (N, Cin, H, W) f32; w: (Cout, Cin, KH, KW); b/gamma/beta: (Cout,).

    `b` (conv bias) is accepted for call-site parity but unused: training-mode
    BN subtracts the per-channel batch mean, which cancels it exactly.
    """
    del b
    n, c_in, h, wd = x.shape
    c_out, c_in_w, kh, kw = w.shape
    pad_h = kh // 2                                   # PyTorch padding=(kh//2, 0)
    hp = h + 2 * pad_h
    ho = hp - kh + 1
    wo = wd - kw + 1
    n_valid = n * ho * wo

    c_out_p = pl.cdiv(c_out, _SUBLANE) * _SUBLANE
    c_in_p = pl.cdiv(c_in_w, _SUBLANE) * _SUBLANE

    ncols = n * hp * wd                                # flat column count
    npo = pl.cdiv(ncols, _LANE) * _LANE                # lane-dense output width
    max_off = (kh - 1) * wd + (kw - 1)                 # largest in-kernel shift
    npi = pl.cdiv(npo + max_off, _LANE) * _LANE        # input slab width

    # ---- input formatting: one transpose + one pad + reshape + lane pad ----
    x_t = jnp.transpose(x.astype(jnp.float32), (1, 0, 2, 3))      # (Cin,N,H,W)
    x_t = jnp.pad(x_t, ((0, c_in_p - c_in), (0, 0), (pad_h, pad_h), (0, 0)))
    x_flat = x_t.reshape(c_in_p, ncols)
    x_flat = jnp.pad(x_flat, ((0, 0), (0, npi - ncols)))           # (CinP,NPI)

    # ---- weights: (Cout,Cin,KH,KW) -> (KH*KW, CoutP, CinP) ----
    w3 = jnp.transpose(w.astype(jnp.float32), (2, 3, 0, 1)).reshape(
        kh * kw, c_out, c_in_w)
    w3 = jnp.pad(w3, ((0, 0), (0, c_out_p - c_out), (0, c_in_p - c_in_w)))

    # ---- BN params packed into one (CoutP, 2) array ----
    params = jnp.stack([gamma.astype(jnp.float32), beta.astype(jnp.float32)],
                       axis=1)
    params = jnp.pad(params, ((0, c_out_p - c_out), (0, 0)))

    # ---- static validity mask over the flat column axis (built host-side) ----
    col = np.arange(npo)
    valid = ((((col // wd) % hp) < ho) & ((col % wd) < wo) & (col < ncols))
    mask = jnp.asarray(valid.astype(np.float32).reshape(1, npo))

    out = pl.pallas_call(
        functools.partial(_bridge_kernel, kh=kh, kw=kw, w_in=wd, eps=eps,
                          inv_n=1.0 / float(n_valid)),
        out_shape=jax.ShapeDtypeStruct((c_out_p, npo), jnp.float32),
        cost_estimate=pl.CostEstimate(
            flops=2 * kh * kw * c_out_p * c_in_p * npo,
            transcendentals=c_out_p,
            bytes_accessed=4 * (c_in_p * npi + kh * kw * c_out_p * c_in_p
                                + 2 * c_out_p + npo + c_out_p * npo)),
    )(x_flat, w3, params, mask)

    # Valid outputs live at columns (n*Hp + ho)*W + wo with ho < Ho, wo < Wo.
    out = out[:c_out, :ncols].reshape(c_out, n, hp, wd)[:, :, :ho, :wo]
    return jnp.transpose(out, (1, 0, 2, 3))


def _reference(x, w, b, gamma, beta, eps=1e-5):
    kh = w.shape[2]
    conv = jax.lax.conv_general_dilated(
        x, w, window_strides=(1, 1),
        padding=((kh // 2, kh // 2), (0, 0)),
        dimension_numbers=("NCHW", "OIHW", "NCHW"),
        precision=jax.lax.Precision.HIGHEST,
    ) + b[None, :, None, None]
    mean = conv.mean(axis=(0, 2, 3), keepdims=True)
    var = jnp.square(conv - mean).mean(axis=(0, 2, 3), keepdims=True)
    y = (conv - mean) * jax.lax.rsqrt(var + eps)
    y = y * gamma[None, :, None, None] + beta[None, :, None, None]
    return jnp.maximum(y, 0.0)


if __name__ == "__main__":
    # Module config: filters=10, kernel_size=(3, 3)
    filters, kh, kw = 10, 3, 3
    batch, height, width = 2, 16, 16

    key = jax.random.PRNGKey(0)
    k_x, k_w, k_b, k_g, k_be = jax.random.split(key, 5)

    x = jax.random.normal(k_x, (batch, filters, height, width), jnp.float32)

    # Deterministic parameter init (PyTorch-style uniform bound for conv).
    fan_in = filters * kh * kw
    bound = 1.0 / float(np.sqrt(fan_in))
    w = jax.random.uniform(k_w, (filters, filters, kh, kw), jnp.float32,
                           -bound, bound)
    b = jax.random.uniform(k_b, (filters,), jnp.float32, -bound, bound)
    gamma = 1.0 + 0.1 * jax.random.normal(k_g, (filters,), jnp.float32)
    beta = 0.1 * jax.random.normal(k_be, (filters,), jnp.float32)

    y = down_unet_2d_bridge_block(x, w, b, gamma, beta)
    y = jax.block_until_ready(y)

    y_ref = _reference(x, w, b, gamma, beta)
    assert y.shape == (batch, filters, height, width - (kw - 1))
    assert jnp.allclose(y, y_ref, atol=1e-3, rtol=1e-3), \
        f"max abs err {jnp.max(jnp.abs(y - y_ref))}"

    print("KERNEL_OK")
</pallas_src>

<mosaic_0001>
module attributes {stable_mosaic.version = 11 : i64} {
  func.func @_bridge_kernel(%arg0: memref<16x768xf32, #tpu.memory_space<vmem>>, %arg1: memref<9x16x16xf32, #tpu.memory_space<vmem>>, %arg2: memref<16x2xf32, #tpu.memory_space<vmem>>, %arg3: memref<1x640xf32, #tpu.memory_space<vmem>>, %arg4: memref<16x640xf32, #tpu.memory_space<vmem>>) attributes {dimension_semantics = [], scalar_prefetch = 0 : i64, scratch_operands = 0 : i64, tpu.core_type = #tpu.core_type<tc>} {
    %c0 = arith.constant 0 : index
    %c0_0 = arith.constant 0 : index
    %0 = vector.load %arg0[%c0, %c0_0] : memref<16x768xf32, #tpu.memory_space<vmem>>, vector<16x640xf32>
    %c0_1 = arith.constant 0 : index
    %c0_2 = arith.constant 0 : index
    %c0_3 = arith.constant 0 : index
    %1 = vector.load %arg1[%c0_1, %c0_2, %c0_3] : memref<9x16x16xf32, #tpu.memory_space<vmem>>, vector<1x16x16xf32>
    %2 = vector.shape_cast %1 : vector<1x16x16xf32> to vector<16x16xf32>
    %cst = arith.constant dense<0.000000e+00> : vector<16x640xf32>
    %3 = tpu.matmul %2, %0, %cst {dimension_numbers = #tpu.dot_dimension_numbers<[1], [0], [0], [1], [0, 0, 1, 1], [], []>} : vector<16x16xf32>, vector<16x640xf32>, vector<16x640xf32> -> vector<16x640xf32>
    %c0_4 = arith.constant 0 : index
    %c1 = arith.constant 1 : index
    %4 = vector.load %arg0[%c0_4, %c1] : memref<16x768xf32, #tpu.memory_space<vmem>>, vector<16x640xf32>
    %c1_5 = arith.constant 1 : index
    %c0_6 = arith.constant 0 : index
    %c0_7 = arith.constant 0 : index
    %5 = vector.load %arg1[%c1_5, %c0_6, %c0_7] : memref<9x16x16xf32, #tpu.memory_space<vmem>>, vector<1x16x16xf32>
    %6 = vector.shape_cast %5 : vector<1x16x16xf32> to vector<16x16xf32>
    %cst_8 = arith.constant dense<0.000000e+00> : vector<16x640xf32>
    %7 = tpu.matmul %6, %4, %cst_8 {dimension_numbers = #tpu.dot_dimension_numbers<[1], [0], [0], [1], [0, 0, 1, 1], [], []>} : vector<16x16xf32>, vector<16x640xf32>, vector<16x640xf32> -> vector<16x640xf32>
    %8 = arith.addf %3, %7 : vector<16x640xf32>
    %c0_9 = arith.constant 0 : index
    %c2 = arith.constant 2 : index
    %9 = vector.load %arg0[%c0_9, %c2] : memref<16x768xf32, #tpu.memory_space<vmem>>, vector<16x640xf32>
    %c2_10 = arith.constant 2 : index
    %c0_11 = arith.constant 0 : index
    %c0_12 = arith.constant 0 : index
    %10 = vector.load %arg1[%c2_10, %c0_11, %c0_12] : memref<9x16x16xf32, #tpu.memory_space<vmem>>, vector<1x16x16xf32>
    %11 = vector.shape_cast %10 : vector<1x16x16xf32> to vector<16x16xf32>
    %cst_13 = arith.constant dense<0.000000e+00> : vector<16x640xf32>
    %12 = tpu.matmul %11, %9, %cst_13 {dimension_numbers = #tpu.dot_dimension_numbers<[1], [0], [0], [1], [0, 0, 1, 1], [], []>} : vector<16x16xf32>, vector<16x640xf32>, vector<16x640xf32> -> vector<16x640xf32>
    %13 = arith.addf %8, %12 : vector<16x640xf32>
    %c0_14 = arith.constant 0 : index
    %c16 = arith.constant 16 : index
    %14 = vector.load %arg0[%c0_14, %c16] : memref<16x768xf32, #tpu.memory_space<vmem>>, vector<16x640xf32>
    %c3 = arith.constant 3 : index
    %c0_15 = arith.constant 0 : index
    %c0_16 = arith.constant 0 : index
    %15 = vector.load %arg1[%c3, %c0_15, %c0_16] : memref<9x16x16xf32, #tpu.memory_space<vmem>>, vector<1x16x16xf32>
    %16 = vector.shape_cast %15 : vector<1x16x16xf32> to vector<16x16xf32>
    %cst_17 = arith.constant dense<0.000000e+00> : vector<16x640xf32>
    %17 = tpu.matmul %16, %14, %cst_17 {dimension_numbers = #tpu.dot_dimension_numbers<[1], [0], [0], [1], [0, 0, 1, 1], [], []>} : vector<16x16xf32>, vector<16x640xf32>, vector<16x640xf32> -> vector<16x640xf32>
    %18 = arith.addf %13, %17 : vector<16x640xf32>
    %c0_18 = arith.constant 0 : index
    %c17 = arith.constant 17 : index
    %19 = vector.load %arg0[%c0_18, %c17] : memref<16x768xf32, #tpu.memory_space<vmem>>, vector<16x640xf32>
    %c4 = arith.constant 4 : index
    %c0_19 = arith.constant 0 : index
    %c0_20 = arith.constant 0 : index
    %20 = vector.load %arg1[%c4, %c0_19, %c0_20] : memref<9x16x16xf32, #tpu.memory_space<vmem>>, vector<1x16x16xf32>
    %21 = vector.shape_cast %20 : vector<1x16x16xf32> to vector<16x16xf32>
    %cst_21 = arith.constant dense<0.000000e+00> : vector<16x640xf32>
    %22 = tpu.matmul %21, %19, %cst_21 {dimension_numbers = #tpu.dot_dimension_numbers<[1], [0], [0], [1], [0, 0, 1, 1], [], []>} : vector<16x16xf32>, vector<16x640xf32>, vector<16x640xf32> -> vector<16x640xf32>
    %23 = arith.addf %18, %22 : vector<16x640xf32>
    %c0_22 = arith.constant 0 : index
    %c18 = arith.constant 18 : index
    %24 = vector.load %arg0[%c0_22, %c18] : memref<16x768xf32, #tpu.memory_space<vmem>>, vector<16x640xf32>
    %c5 = arith.constant 5 : index
    %c0_23 = arith.constant 0 : index
    %c0_24 = arith.constant 0 : index
    %25 = vector.load %arg1[%c5, %c0_23, %c0_24] : memref<9x16x16xf32, #tpu.memory_space<vmem>>, vector<1x16x16xf32>
    %26 = vector.shape_cast %25 : vector<1x16x16xf32> to vector<16x16xf32>
    %cst_25 = arith.constant dense<0.000000e+00> : vector<16x640xf32>
    %27 = tpu.matmul %26, %24, %cst_25 {dimension_numbers = #tpu.dot_dimension_numbers<[1], [0], [0], [1], [0, 0, 1, 1], [], []>} : vector<16x16xf32>, vector<16x640xf32>, vector<16x640xf32> -> vector<16x640xf32>
    %28 = arith.addf %23, %27 : vector<16x640xf32>
    %c0_26 = arith.constant 0 : index
    %c32 = arith.constant 32 : index
    %29 = vector.load %arg0[%c0_26, %c32] : memref<16x768xf32, #tpu.memory_space<vmem>>, vector<16x640xf32>
    %c6 = arith.constant 6 : index
    %c0_27 = arith.constant 0 : index
    %c0_28 = arith.constant 0 : index
    %30 = vector.load %arg1[%c6, %c0_27, %c0_28] : memref<9x16x16xf32, #tpu.memory_space<vmem>>, vector<1x16x16xf32>
    %31 = vector.shape_cast %30 : vector<1x16x16xf32> to vector<16x16xf32>
    %cst_29 = arith.constant dense<0.000000e+00> : vector<16x640xf32>
    %32 = tpu.matmul %31, %29, %cst_29 {dimension_numbers = #tpu.dot_dimension_numbers<[1], [0], [0], [1], [0, 0, 1, 1], [], []>} : vector<16x16xf32>, vector<16x640xf32>, vector<16x640xf32> -> vector<16x640xf32>
    %33 = arith.addf %28, %32 : vector<16x640xf32>
    %c0_30 = arith.constant 0 : index
    %c33 = arith.constant 33 : index
    %34 = vector.load %arg0[%c0_30, %c33] : memref<16x768xf32, #tpu.memory_space<vmem>>, vector<16x640xf32>
    %c7 = arith.constant 7 : index
    %c0_31 = arith.constant 0 : index
    %c0_32 = arith.constant 0 : index
    %35 = vector.load %arg1[%c7, %c0_31, %c0_32] : memref<9x16x16xf32, #tpu.memory_space<vmem>>, vector<1x16x16xf32>
    %36 = vector.shape_cast %35 : vector<1x16x16xf32> to vector<16x16xf32>
    %cst_33 = arith.constant dense<0.000000e+00> : vector<16x640xf32>
    %37 = tpu.matmul %36, %34, %cst_33 {dimension_numbers = #tpu.dot_dimension_numbers<[1], [0], [0], [1], [0, 0, 1, 1], [], []>} : vector<16x16xf32>, vector<16x640xf32>, vector<16x640xf32> -> vector<16x640xf32>
    %38 = arith.addf %33, %37 : vector<16x640xf32>
    %c0_34 = arith.constant 0 : index
    %c34 = arith.constant 34 : index
    %39 = vector.load %arg0[%c0_34, %c34] : memref<16x768xf32, #tpu.memory_space<vmem>>, vector<16x640xf32>
    %c8 = arith.constant 8 : index
    %c0_35 = arith.constant 0 : index
    %c0_36 = arith.constant 0 : index
    %40 = vector.load %arg1[%c8, %c0_35, %c0_36] : memref<9x16x16xf32, #tpu.memory_space<vmem>>, vector<1x16x16xf32>
    %41 = vector.shape_cast %40 : vector<1x16x16xf32> to vector<16x16xf32>
    %cst_37 = arith.constant dense<0.000000e+00> : vector<16x640xf32>
    %42 = tpu.matmul %41, %39, %cst_37 {dimension_numbers = #tpu.dot_dimension_numbers<[1], [0], [0], [1], [0, 0, 1, 1], [], []>} : vector<16x16xf32>, vector<16x640xf32>, vector<16x640xf32> -> vector<16x640xf32>
    %43 = arith.addf %38, %42 : vector<16x640xf32>
    %c0_38 = arith.constant 0 : index
    %c0_39 = arith.constant 0 : index
    %44 = vector.load %arg3[%c0_38, %c0_39] : memref<1x640xf32, #tpu.memory_space<vmem>>, vector<1x640xf32>
    %45 = vector.broadcast %44 : vector<1x640xf32> to vector<16x640xf32>
    %46 = arith.mulf %43, %45 : vector<16x640xf32>
    %cst_40 = arith.constant dense<0.000000e+00> : vector<16xf32>
    %47 = vector.multi_reduction <add>, %46, %cst_40 [1] : vector<16x640xf32> to vector<16xf32>
    %48 = vector.shape_cast %47 : vector<16xf32> to vector<16x1xf32>
    %49 = arith.mulf %46, %43 : vector<16x640xf32>
    %cst_41 = arith.constant dense<0.000000e+00> : vector<16xf32>
    %50 = vector.multi_reduction <add>, %49, %cst_41 [1] : vector<16x640xf32> to vector<16xf32>
    %51 = vector.shape_cast %50 : vector<16xf32> to vector<16x1xf32>
    %cst_42 = arith.constant 0.00223214296 : f32
    %52 = vector.broadcast %cst_42 : f32 to vector<16x1xf32>
    %53 = arith.mulf %48, %52 : vector<16x1xf32>
    %cst_43 = arith.constant 0.00223214296 : f32
    %54 = vector.broadcast %cst_43 : f32 to vector<16x1xf32>
    %55 = arith.mulf %51, %54 : vector<16x1xf32>
    %56 = arith.mulf %53, %53 : vector<16x1xf32>
    %57 = arith.subf %55, %56 : vector<16x1xf32>
    %c0_44 = arith.constant 0 : index
    %c0_45 = arith.constant 0 : index
    %58 = vector.load %arg2[%c0_44, %c0_45] : memref<16x2xf32, #tpu.memory_space<vmem>>, vector<16x1xf32>
    %cst_46 = arith.constant 9.99999974E-6 : f32
    %59 = vector.broadcast %cst_46 : f32 to vector<16x1xf32>
    %60 = arith.addf %57, %59 : vector<16x1xf32>
    %61 = math.rsqrt %60 : vector<16x1xf32>
    %62 = arith.mulf %58, %61 : vector<16x1xf32>
    %c0_47 = arith.constant 0 : index
    %c1_48 = arith.constant 1 : index
    %63 = vector.load %arg2[%c0_47, %c1_48] : memref<16x2xf32, #tpu.memory_space<vmem>>, vector<16x1xf32>
    %64 = arith.mulf %53, %62 : vector<16x1xf32>
    %65 = arith.subf %63, %64 : vector<16x1xf32>
    %66 = vector.broadcast %62 : vector<16x1xf32> to vector<16x640xf32>
    %67 = arith.mulf %43, %66 : vector<16x640xf32>
    %68 = vector.broadcast %65 : vector<16x1xf32> to vector<16x640xf32>
    %69 = arith.addf %67, %68 : vector<16x640xf32>
    %cst_49 = arith.constant 0.000000e+00 : f32
    %70 = vector.broadcast %cst_49 : f32 to vector<16x640xf32>
    %71 = arith.maximumf %69, %70 : vector<16x640xf32>
    %c0_50 = arith.constant 0 : index
    %c0_51 = arith.constant 0 : index
    %72 = vector.load %arg4[%c0_50, %c0_51] : memref<16x640xf32, #tpu.memory_space<vmem>>, vector<16x640xf32>
    tpu.vector_store %arg4[%c0_50, %c0_51], %71 {strides = array<i32>} : memref<16x640xf32, #tpu.memory_space<vmem>>, vector<16x640xf32>,
    return
  }
}

</mosaic_0001>

<bundles_post_ra>
// kernel: down_unet_2d_bridge_block.1
= control target key start
LH: loop header
LB: loop body
LE: loop exit
PB: predicated region body
PF: predicated region fallthrough
CT: control target
= control target key end

     0   :  { %vm101_vm0 = vcmask 130048   ;;  %s3402_s5 = smov 127   ;;  %v3403_v22 = vmov 0.0   ;;  %s3405_s16 = smov 112   ;;  %vm80_vm1 = vcmask 1039360   ;;  %vm599_vm2 = vcmask 1031168   ;;  %s4123_s0 = inlined_call_operand.vmem [shape: f32[16,768], index: 0, kind: input, shape index: {}]   ;;  %s4124_s1 = inlined_call_operand.vmem [shape: f32[9,16,16], index: 1, kind: input, shape index: {}]   ;;  %s4125_s3 = inlined_call_operand.vmem [shape: f32[1,640], index: 3, kind: input, shape index: {}]   ;;  %s4126_s2 = inlined_call_operand.vmem [shape: f32[16,2], index: 2, kind: input, shape index: {}]   ;;  %s4127_s4 = inlined_call_operand.vmem [shape: f32[16,640], index: 4, kind: output, shape index: {}]  }
   0x1   :  { %v3442_v0 = vld [vmem:[%s4123_s0 + $0x20] sm:$0xff]  ;;  %v3447_v1 = vld [vmem:[%s4123_s0 + $0x28] sm:$0xff]  ;;  %v3461_v4 = vld [vmem:[%s4123_s0 + $0x10] sm:$0xff]  ;;  %172 = vmatprep.mubr.f32.mxu1 %v3403_v22  ;;  %s3406_s17 = smov 111   ;;  %s3407_s18 = smov 110   ;;  %vm892_vm3 = vcmask 916480  }
   0x2   :  { %v3452_v2 = vld [vmem:[%s4123_s0 + $0x8] sm:$0xff]  ;;  %v3456_v3 = vpack.i.bf16 %v3447_v1, %v3442_v0  ;;  %v3466_v5 = vld [vmem:[%s4123_s0 + $0x50] sm:$0xff]  ;;  %v3471_v6 = vld [vmem:[%s4123_s0 + $0x58] sm:$0xff]  ;;  %s3408_s19 = smov 96   ;;  %s3409_s20 = smov 95   ;;  %vm1185_vm4 = vcmask 908288  }
   0x3   :  { %v3475_v7 = vpack.i.bf16 %v3461_v4, %v3452_v2  ;;  %v3480_v8 = vld [vmem:[%s4123_s0 + $0x38] sm:$0xff]  ;;  %v3485_v9 = vld [vmem:[%s4123_s0 + $0x40] sm:$0xff]  ;;  %v3390_v10 = vpack.i.bf16 %v3471_v6, %v3447_v1  ;;  %v3492_v11 = vpack.i.bf16 %v3471_v6, %v3466_v5  ;;  %v3502_v13 = vld [vmem:[%s4123_s0 + $0x48] sm:$0xff]  ;;  %v3532_v20 = vpack.c.bf16 %v3466_v5, %v3442_v0  ;;  %s3410_s21 = smov 94   ;;  %s3413_s7 = smov 1  }
   0x4   :  { %3156 = vrot.lane.b32.xlu0 %v3456_v3, %s3402_s5  ;;  %v3497_v12 = vld [vmem:[%s4123_s0 + $0x18] sm:$0xff]  ;;  %v3507_v14 = vpack.i.bf16 %v3485_v9, %v3480_v8  ;;  %v3512_v15 = vld [vmem:[%s4123_s0] sm:$0xff]  ;;  %v3517_v16 = vld [vmem:[%s4123_s0 + $0x30] sm:$0xff]  ;;  %v3385_v18 = vpack.i.bf16 %v3466_v5, %v3502_v13  ;;  %s3404_s0 = smov 126   ;;  %v2967_v24 = vpack.c.bf16 %v3480_v8, %v3452_v2  ;;  %v2973_v27 = vpack.c.bf16 %v3485_v9, %v3461_v4 }
   0x5   :  { %3166 = vrot.lane.b32.xlu1 %v3475_v7, %s3402_s5  ;;  %v3380_v17 = vpack.i.bf16 %v3442_v0, %v3497_v12  ;;  %v3526_v19 = vld [vmem:[%s4124_s1 + $0x10] sm:$0xff]  ;;  %v3175_v21 = vpack.i.bf16 %v3517_v16, %v3512_v15  ;;  %v3195_v23 = vpack.i.bf16 %v3502_v13, %v3497_v12  ;;  %v2969_v25 = vpack.c.bf16 %v3517_v16, %v3512_v15  ;;  %v3595_v54 = vld [vmem:[%s4124_s1 + $0x18] sm:$0xff]  ;;  %v3603_v57 = vld [vmem:[%s4124_s1] sm:$0xff] }
   0x6   :  { %2896 = vmatprep.mubr.msk.f32.mxu0 %vm101_vm0, %v3526_v19  ;;  %v2971_v26 = vpack.c.bf16 %v3502_v13, %v3497_v12  ;;  %v3679_v2 = vld [vmem:[%s4124_s1 + $0x28] sm:$0xff]  ;;  %v3730_v12 = vld [vmem:[%s4124_s1 + $0x30] sm:$0xff]  ;;  %vm1478_vm5 = vcmask 900096   ;;  %vm1771_vm6 = vcmask 785408   ;;  %vm2064_vm7 = vcmask 777216  }
   0x7   :  { %vm2357_vm8 = vcmask 769024  }
   0x8   :  { %3161 = vrot.lane.b32.xlu0 %v3492_v11, %s3402_s5 }
   0x9   :  { %3171 = vrot.lane.b32.xlu1 %v3507_v14, %s3402_s5 }
   0xc   :  { %3176 = vrot.lane.b32.xlu0 %v3175_v21, %s3402_s5 }
   0xd   :  { %3181 = vrot.lane.b32.xlu1 %v3475_v7, %s3404_s0 }
  0x10   :  { %3186 = vrot.lane.b32.xlu0 %v3507_v14, %s3404_s0 }
  0x11   :  { %3191 = vrot.lane.b32.xlu1 %v3175_v21, %s3404_s0 }
  0x14   :  { %3196 = vrot.lane.b32.xlu0 %v3195_v23, %s3402_s5 }
  0x15   :  { %3201 = vrot.lane.b32.xlu1 %v3456_v3, %s3404_s0 }
  0x18   :  { %3206 = vrot.lane.b32.xlu0 %v3492_v11, %s3404_s0 }
  0x19   :  { %3211 = vrot.lane.b32.xlu1 %v3475_v7, %s3405_s16 }
  0x1c   :  { %3216 = vrot.lane.b32.xlu0 %v3507_v14, %s3405_s16 }
  0x1d   :  { %3221 = vrot.lane.b32.xlu1 %v3175_v21, %s3405_s16 }
  0x20   :  { %3226 = vrot.lane.b32.xlu0 %v3456_v3, %s3405_s16 }
  0x21   :  { %3231 = vrot.lane.b32.xlu1 %v3492_v11, %s3405_s16 }
  0x24   :  { %3236 = vrot.lane.b32.xlu0 %v3475_v7, %s3406_s17 }
  0x25   :  { %3241 = vrot.lane.b32.xlu1 %v3507_v14, %s3406_s17 }
  0x28   :  { %3246 = vrot.lane.b32.xlu0 %v3175_v21, %s3406_s17 }
  0x29   :  { %3251 = vrot.lane.b32.xlu1 %v3195_v23, %s3404_s0 }
  0x2c   :  { %3256 = vrot.lane.b32.xlu0 %v3456_v3, %s3406_s17 }
  0x2d   :  { %3261 = vrot.lane.b32.xlu1 %v3492_v11, %s3406_s17 }
  0x30   :  { %3266 = vrot.lane.b32.xlu0 %v3475_v7, %s3407_s18 }
  0x31   :  { %3271 = vrot.lane.b32.xlu1 %v3507_v14, %s3407_s18 }
  0x34   :  { %3276 = vrot.lane.b32.xlu0 %v3195_v23, %s3405_s16 }
  0x35   :  { %3281 = vrot.lane.b32.xlu1 %v3175_v21, %s3407_s18 }
  0x38   :  { %3286 = vrot.lane.b32.xlu0 %v3456_v3, %s3407_s18 }
  0x39   :  { %3291 = vrot.lane.b32.xlu1 %v3492_v11, %s3407_s18 }
  0x3c   :  { %3296 = vrot.lane.b32.xlu0 %v3195_v23, %s3406_s17 }
  0x3d   :  { %3301 = vrot.lane.b32.xlu1 %v3475_v7, %s3408_s19 }
  0x40   :  { %3306 = vrot.lane.b32.xlu0 %v3507_v14, %s3408_s19 }
  0x41   :  { %3311 = vrot.lane.b32.xlu1 %v3175_v21, %s3408_s19 }
  0x44   :  { %3316 = vrot.lane.b32.xlu0 %v3195_v23, %s3407_s18 }
  0x45   :  { %3321 = vrot.lane.b32.xlu1 %v3456_v3, %s3408_s19 }
  0x48   :  { %3326 = vrot.lane.b32.xlu0 %v3492_v11, %s3408_s19 }
  0x49   :  { %3331 = vrot.lane.b32.xlu1 %v3475_v7, %s3409_s20 }
  0x4c   :  { %3336 = vrot.lane.b32.xlu0 %v3507_v14, %s3409_s20 }
  0x4d   :  { %3341 = vrot.lane.b32.xlu1 %v3195_v23, %s3408_s19 }
  0x50   :  { %3346 = vrot.lane.b32.xlu0 %v3175_v21, %s3409_s20 }
  0x51   :  { %3351 = vrot.lane.b32.xlu1 %v3456_v3, %s3409_s20 }
  0x54   :  { %3356 = vrot.lane.b32.xlu0 %v3492_v11, %s3409_s20 }
  0x55   :  { %3361 = vrot.lane.b32.xlu1 %v3195_v23, %s3409_s20 }
  0x58   :  { %3366 = vrot.lane.b32.xlu0 %v3475_v7, %s3410_s21 }
  0x59   :  { %3371 = vrot.lane.b32.xlu1 %v3507_v14, %s3410_s21 }
  0x5c   :  { %3376 = vrot.lane.b32.xlu0 %v3175_v21, %s3410_s21 }
  0x5d   :  { %3381 = vrot.lane.b32.xlu1 %v3380_v17, %s3410_s21 }
  0x60   :  { %3386 = vrot.lane.b32.xlu0 %v3385_v18, %s3410_s21 }
  0x61   :  { %3391 = vrot.lane.b32.xlu1 %v3390_v10, %s3410_s21 }
  0x76   :  { %v3578_v28 = vpop.permute.xlu0 %3156 }
  0x77   :  { %v3167_v29 = vpop.permute.xlu1 %3166  ;;  %v3159_v32 = vunpack.i.h.bf16 %v3578_v28  ;;  %v3158_v33 = vunpack.i.l.bf16 %v3578_v28  ;;  %v3634_v28 = vld [vmem:[%s4124_s1 + $0x8] sm:$0xff] }
  0x78   :  { %v3169_v30 = vunpack.i.h.bf16 %v3167_v29  ;;  %v3168_v31 = vunpack.i.l.bf16 %v3167_v29 }
  0x79   :  { %v85_v41 = vsel %vm80_vm1, %v3158_v33, %v3159_v32 }
  0x7a   :  { %v3162_v34 = vpop.permute.xlu0 %3161  ;;  %v82_v40 = vsel %vm80_vm1, %v3168_v31, %v3169_v30 }
  0x7b   :  { %v3164_v35 = vunpack.i.h.bf16 %v3162_v34  ;;  %v3163_v36 = vunpack.i.l.bf16 %v3162_v34  ;;  %v3172_v37 = vpop.permute.xlu1 %3171 }
  0x7c   :  { %v3174_v38 = vunpack.i.h.bf16 %v3172_v37  ;;  %v3173_v39 = vunpack.i.l.bf16 %v3172_v37 }
  0x7d   :  { %v90_v42 = vsel %vm80_vm1, %v3163_v36, %v3164_v35 }
  0x7e   :  { %v3177_v43 = vpop.permute.xlu0 %3176  ;;  %v87_v44 = vsel %vm80_vm1, %v3173_v39, %v3174_v38  ;;  %v2963_v45 = vpack.c.bf16 %v90_v42, %v85_v41 }
  0x7f   :  { %v3586_v46 = vpop.permute.xlu1 %3181  ;;  %v3179_v47 = vunpack.i.h.bf16 %v3177_v43  ;;  %v3178_v48 = vunpack.i.l.bf16 %v3177_v43  ;;  %v2955_v49 = vpack.c.bf16 %v87_v44, %v82_v40 }
  0x80   :  { %v3184_v50 = vunpack.i.h.bf16 %v3586_v46  ;;  %v3183_v51 = vunpack.i.l.bf16 %v3586_v46  ;;  %2964 = vmatprep.subr.bf16.mxu0 %v2963_v45 }
  0x81   :  { %2956 = vmatprep.subr.bf16.mxu1 %v2955_v49  ;;  %2966 = vmatpush3.bf16.msra.mxu0 %v2963_v45  ;;  %v81_v52 = vsel %vm80_vm1, %v3178_v48, %v3168_v31  ;;  %v86_v53 = vsel %vm80_vm1, %v3179_v47, %v3173_v39  ;;  %v3654_v39 = vld [vmem:[%s4124_s1 + $0x20] sm:$0xff] }
  0x82   :  { %v3597_v55 = vpop.permute.xlu0 %3186  ;;  %v2957_v56 = vpack.c.bf16 %v86_v53, %v81_v52  ;;  %2976 = vmatprep.subr.bf16.mxu0 %v3532_v20  ;;  %v601_v61 = vsel %vm599_vm2, %v3183_v51, %v3184_v50 }
  0x83   :  { %v3192_v58 = vpop.permute.xlu1 %3191  ;;  %v3189_v59 = vunpack.i.h.bf16 %v3597_v55  ;;  %v3188_v60 = vunpack.i.l.bf16 %v3597_v55 }
  0x84   :  { %v3194_v62 = vunpack.i.h.bf16 %v3192_v58  ;;  %v3193_v63 = vunpack.i.l.bf16 %v3192_v58  ;;  %2958 = vmatpush1.bf16.msra.mxu1 %v2957_v56  ;;  %2897 = vmatmul.mubr.msk.f32.vlgmr.msra.gmra.mrb[0].mxu0 %vm101_vm0, %v3595_v54 }
  0x85   :  { %2978 = vmatpush3.bf16.msra.mxu0 %v3532_v20  ;;  %v606_v0 = vsel %vm599_vm2, %v3188_v60, %v3189_v59  ;;  %2903 = vmatprep.mubr.msk.f32.mxu0 %vm101_vm0, %v3603_v57 }
  0x86   :  { %v3197_v1 = vpop.permute.xlu0 %3196  ;;  %v2979_v3 = vpack.c.bf16 %v606_v0, %v601_v61  ;;  %v600_v10 = vsel %vm599_vm2, %v3193_v63, %v3183_v51  ;;  %v605_v11 = vsel %vm599_vm2, %v3194_v62, %v3188_v60 }
  0x87   :  { %v3618_v5 = vpop.permute.xlu1 %3201  ;;  %v3199_v6 = vunpack.i.h.bf16 %v3197_v1  ;;  %v3198_v7 = vunpack.i.l.bf16 %v3197_v1  ;;  %2788 = vmatmul.mubr.msk.f32.vlgmr.msra.gmra.mrb[0].mxu1 %vm101_vm0, %v3526_v19  ;;  %v2981_v34 = vpack.c.bf16 %v605_v11, %v600_v10 }
  0x88   :  { %v3204_v14 = vunpack.i.h.bf16 %v3618_v5  ;;  %v3203_v17 = vunpack.i.l.bf16 %v3618_v5  ;;  %2980 = vmatprep.subr.bf16.mxu0 %v2979_v3  ;;  %178 = vmatprep.mubr.f32.mxu1 %v3403_v22 }
  0x89   :  { %v88_v18 = vsel %vm80_vm1, %v3174_v38, %v3199_v6  ;;  %v83_v20 = vsel %vm80_vm1, %v3169_v30, %v3198_v7  ;;  %v84_v21 = vsel %vm80_vm1, %v3198_v7, %v3158_v33  ;;  %v89_v23 = vsel %vm80_vm1, %v3199_v6, %v3163_v36 }
  0x8a   :  { %v2961_v29 = vpack.c.bf16 %v88_v18, %v83_v20  ;;  %v3636_v31 = vpop.permute.xlu0 %3206  ;;  %v2959_v32 = vpack.c.bf16 %v89_v23, %v84_v21  ;;  %v604_v33 = vsel %vm599_vm2, %v3203_v17, %v3204_v14  ;;  %v3750_v23 = vld [vmem:[%s4124_s1 + $0x38] sm:$0xff] }
  0x8b   :  { %v3638_v35 = vpop.permute.xlu1 %3211  ;;  %v3209_v37 = vunpack.i.h.bf16 %v3636_v31  ;;  %v3208_v30 = vunpack.i.l.bf16 %v3636_v31  ;;  %2789 = vmatmul.mubr.msk.f32.gmra.mrb[2].mxu1 %vm101_vm0, %v3595_v54 }
  0x8c   :  { %v3214_v36 = vunpack.i.h.bf16 %v3638_v35  ;;  %v3213_v38 = vunpack.i.l.bf16 %v3638_v35  ;;  %2960 = vmatprep.subr.bf16.mxu1 %v2959_v32  ;;  %2904 = vmatmul.mubr.msk.f32.vlgmr.msra.gmra.mrb[0].mxu0 %vm101_vm0, %v3634_v28 }
  0x8d   :  { %2982 = vmatpush1.bf16.msra.mxu0 %v2981_v34  ;;  %2962 = vmatpush1.bf16.msra.mxu1 %v2961_v29  ;;  %v609_v40 = vsel %vm599_vm2, %v3208_v30, %v3209_v37 }
  0x8e   :  { %v3659_v41 = vpop.permute.xlu0 %3216  ;;  %249 = vmatprep.mubr.f32.mxu1 %v3403_v22  ;;  %690 = vmatprep.mubr.f32.mxu0 %v3403_v22  ;;  %v2987_v42 = vpack.c.bf16 %v609_v40, %v604_v33  ;;  %v894_v47 = vsel %vm892_vm3, %v3213_v38, %v3214_v36 }
  0x8f   :  { %v3222_v43 = vpop.permute.xlu1 %3221  ;;  %v3219_v44 = vunpack.i.h.bf16 %v3659_v41  ;;  %v3218_v45 = vunpack.i.l.bf16 %v3659_v41  ;;  %2968 = vmatprep.subr.bf16.mxu1 %v2967_v24 }
  0x90   :  { %v3224_v48 = vunpack.i.h.bf16 %v3222_v43  ;;  %v3223_v49 = vunpack.i.l.bf16 %v3222_v43  ;;  %2790 = vmatmul.mubr.msk.f32.vlgmr.msra.gmra.mrb[4].mxu1 %vm101_vm0, %v3526_v19  ;;  %2802 = vmatmul.mubr.msk.f32.vlgmr.msra.gmra.mrb[2].mxu0 %vm101_vm0, %v3654_v39 }
  0x91   :  { %2988 = vmatprep.subr.bf16.mxu0 %v2987_v42  ;;  %255 = vmatprep.mubr.f32.mxu1 %v3403_v22  ;;  %v899_v8 = vsel %vm892_vm3, %v3218_v45, %v3219_v44 }
  0x92   :  { %2990 = vmatpush3.bf16.msra.mxu0 %v2987_v42  ;;  %v3684_v24 = vpop.permute.xlu0 %3226  ;;  %696 = vmatprep.mubr.f32.mxu0 %v3403_v22  ;;  %v2991_v19 = vpack.c.bf16 %v899_v8, %v894_v47  ;;  %v893_v56 = vsel %vm892_vm3, %v3223_v49, %v3213_v38  ;;  %v898_v58 = vsel %vm892_vm3, %v3224_v48, %v3218_v45  ;;  %v3802_v49 = vld [vmem:[%s4124_s1 + $0x40] sm:$0xff] }
  0x93   :  { %v3687_v51 = vpop.permute.xlu1 %3231  ;;  %v3229_v52 = vunpack.i.h.bf16 %v3684_v24  ;;  %v3228_v53 = vunpack.i.l.bf16 %v3684_v24  ;;  %2970 = vmatpush1.bf16.msra.mxu1 %v2969_v25 }
  0x94   :  { %v3234_v60 = vunpack.i.h.bf16 %v3687_v51  ;;  %v3233_v61 = vunpack.i.l.bf16 %v3687_v51  ;;  %2791 = vmatmul.mubr.msk.f32.gmra.mrb[6].mxu1 %vm101_vm0, %v3595_v54  ;;  %2803 = vmatmul.mubr.msk.f32.gmra.mrb[4].mxu0 %vm101_vm0, %v3679_v2  ;;  %v2993_v54 = vpack.c.bf16 %v898_v58, %v893_v56 }
  0x95   :  { %2992 = vmatprep.subr.bf16.mxu0 %v2991_v19  ;;  %407 = vmatprep.mubr.f32.mxu1 %v3403_v22  ;;  %v897_v15 = vsel %vm892_vm3, %v3228_v53, %v3229_v52 }
  0x96   :  { %v3706_v16 = vpop.permute.xlu0 %3236  ;;  %2910 = vmatprep.mubr.msk.f32.mxu0 %vm101_vm0, %v3654_v39  ;;  %v902_v25 = vsel %vm892_vm3, %v3233_v61, %v3234_v60  ;;  %2972 = vmatprep.subr.bf16.mxu1 %v2971_v26 }
  0x97   :  { %v3716_v62 = vpop.permute.xlu1 %3241  ;;  %v3239_v63 = vunpack.i.h.bf16 %v3706_v16  ;;  %v3238_v0 = vunpack.i.l.bf16 %v3706_v16  ;;  %v2999_v1 = vpack.c.bf16 %v902_v25, %v897_v15 }
  0x98   :  { %v3244_v3 = vunpack.i.h.bf16 %v3716_v62  ;;  %v3243_v6 = vunpack.i.l.bf16 %v3716_v62  ;;  %2794 = vmatmul.mubr.msk.f32.vlgmr.msra.gmra.mrb[0].mxu1 %vm101_vm0, %v3603_v57  ;;  %2911 = vmatmul.mubr.msk.f32.vlgmr.msra.gmra.mrb[0].mxu0 %vm101_vm0, %v3679_v2 }
  0x99   :  { %2994 = vmatpush1.bf16.msra.mxu0 %v2993_v54  ;;  %413 = vmatprep.mubr.f32.mxu1 %v3403_v22  ;;  %v1187_v13 = vsel %vm1185_vm4, %v3238_v0, %v3239_v63 }
  0x9a   :  { %3000 = vmatprep.subr.bf16.mxu0 %v2999_v1  ;;  %v3247_v26 = vpop.permute.xlu0 %3246  ;;  %983 = vmatprep.mubr.f32.mxu0 %v3403_v22  ;;  %v1192_v7 = vsel %vm1185_vm4, %v3243_v6, %v3244_v3 }
  0x9b   :  { %v3252_v10 = vpop.permute.xlu1 %3251  ;;  %v3249_v11 = vunpack.i.h.bf16 %v3247_v26  ;;  %v3248_v14 = vunpack.i.l.bf16 %v3247_v26  ;;  %2974 = vmatpush1.bf16.msra.mxu1 %v2973_v27  ;;  %v3003_v18 = vpack.c.bf16 %v1192_v7, %v1187_v13 }
  0x9c   :  { %v3254_v20 = vunpack.i.h.bf16 %v3252_v10  ;;  %v3253_v21 = vunpack.i.l.bf16 %v3252_v10  ;;  %2795 = vmatmul.mubr.msk.f32.gmra.mrb[2].mxu1 %vm101_vm0, %v3634_v28  ;;  %2810 = vmatmul.mubr.msk.f32.vlgmr.msra.gmra.mrb[2].mxu0 %vm101_vm0, %v3730_v12 }
  0x9d   :  { %3002 = vmatpush3.bf16.msra.mxu0 %v2999_v1  ;;  %989 = vmatprep.mubr.f32.mxu0 %v3403_v22  ;;  %v1191_v27 = vsel %vm1185_vm4, %v3249_v11, %v3243_v6  ;;  %v1186_v32 = vsel %vm1185_vm4, %v3248_v14, %v3238_v0  ;;  %v3828_v6 = vld [vmem:[%s4124_s1 + $0x48] sm:$0xff] }
  0x9e   :  { %v602_v4 = vsel %vm599_vm2, %v3184_v50, %v3253_v21  ;;  %v607_v9 = vsel %vm599_vm2, %v3189_v59, %v3254_v20  ;;  %3004 = vmatprep.subr.bf16.mxu0 %v3003_v18  ;;  %v3759_v29 = vpop.permute.xlu0 %3256  ;;  %484 = vmatprep.mubr.f32.mxu1 %v3403_v22  ;;  %v603_v50 = vsel %vm599_vm2, %v3253_v21, %v3203_v17 }
  0x9f   :  { %v3763_v34 = vpop.permute.xlu1 %3261  ;;  %v3259_v37 = vunpack.i.h.bf16 %v3759_v29  ;;  %v3258_v46 = vunpack.i.l.bf16 %v3759_v29  ;;  %v2985_v55 = vpack.c.bf16 %v607_v9, %v602_v4  ;;  %v608_v38 = vsel %vm599_vm2, %v3254_v20, %v3208_v30 }
  0xa0   :  { %v3264_v59 = vunpack.i.h.bf16 %v3763_v34  ;;  %v3263_v33 = vunpack.i.l.bf16 %v3763_v34  ;;  %2811 = vmatmul.mubr.msk.f32.gmra.mrb[4].mxu0 %vm101_vm0, %v3750_v23  ;;  %2796 = vmatmul.mubr.msk.f32.vlgmr.msra.gmra.mrb[4].mxu1 %vm101_vm0, %v3603_v57  ;;  %v2983_v40 = vpack.c.bf16 %v608_v38, %v603_v50  ;;  %v3005_v30 = vpack.c.bf16 %v1191_v27, %v1186_v32  ;;  %v3878_v50 = vld [vmem:[%s4124_s1 + $0x50] sm:$0xff] }
  0xa1   :  { %2917 = vmatprep.mubr.msk.f32.mxu0 %vm101_vm0, %v3730_v12  ;;  %v1190_v5 = vsel %vm1185_vm4, %v3258_v46, %v3259_v37  ;;  %490 = vmatprep.mubr.f32.mxu1 %v3403_v22 }
  0xa2   :  { %v3785_v17 = vpop.permute.xlu0 %3266  ;;  %v1195_v31 = vsel %vm1185_vm4, %v3263_v33, %v3264_v59  ;;  %2984 = vmatprep.subr.bf16.mxu1 %v2983_v40 }
  0xa3   :  { %v3790_v57 = vpop.permute.xlu1 %3271  ;;  %v3269_v42 = vunpack.i.h.bf16 %v3785_v17  ;;  %v3268_v43 = vunpack.i.l.bf16 %v3785_v17  ;;  %v3011_v45 = vpack.c.bf16 %v1195_v31, %v1190_v5  ;;  %2986 = vmatpush1.bf16.msra.mxu1 %v2985_v55 }
  0xa4   :  { %v3274_v47 = vunpack.i.h.bf16 %v3790_v57  ;;  %v3273_v48 = vunpack.i.l.bf16 %v3790_v57  ;;  %2918 = vmatmul.mubr.msk.f32.vlgmr.msra.gmra.mrb[0].mxu0 %vm101_vm0, %v3750_v23  ;;  %2797 = vmatmul.mubr.msk.f32.gmra.mrb[6].mxu1 %vm101_vm0, %v3634_v28 }
  0xa5   :  { %3006 = vmatpush1.bf16.msra.mxu0 %v3005_v30  ;;  %1276 = vmatprep.mubr.f32.mxu0 %v3403_v22  ;;  %v1480_v8 = vsel %vm1478_vm5, %v3268_v43, %v3269_v42 }
  0xa6   :  { %3012 = vmatprep.subr.bf16.mxu0 %v3011_v45  ;;  %v3277_v19 = vpop.permute.xlu0 %3276  ;;  %v1485_v52 = vsel %vm1478_vm5, %v3273_v48, %v3274_v47  ;;  %767 = vmatprep.mubr.f32.mxu1 %v3403_v22 }
  0xa7   :  { %v3282_v56 = vpop.permute.xlu1 %3281  ;;  %v3279_v58 = vunpack.i.h.bf16 %v3277_v19  ;;  %v3278_v60 = vunpack.i.l.bf16 %v3277_v19  ;;  %v3015_v15 = vpack.c.bf16 %v1485_v52, %v1480_v8 }
  0xa8   :  { %v3284_v25 = vunpack.i.h.bf16 %v3282_v56  ;;  %v3283_v54 = vunpack.i.l.bf16 %v3282_v56  ;;  %2818 = vmatmul.mubr.msk.f32.vlgmr.msra.gmra.mrb[2].mxu0 %vm101_vm0, %v3802_v49  ;;  %2804 = vmatmul.mubr.msk.f32.vlgmr.msra.gmra.mrb[4].mxu1 %vm101_vm0, %v3654_v39 }
  0xa9   :  { %v895_v0 = vsel %vm892_vm3, %v3214_v36, %v3278_v60  ;;  %v900_v28 = vsel %vm892_vm3, %v3219_v44, %v3279_v58  ;;  %3014 = vmatpush3.bf16.msra.mxu0 %v3011_v45  ;;  %1282 = vmatprep.mubr.f32.mxu0 %v3403_v22  ;;  %v896_v1 = vsel %vm892_vm3, %v3278_v60, %v3228_v53 }
  0xaa   :  { %v1479_v35 = vsel %vm1478_vm5, %v3283_v54, %v3268_v43  ;;  %3016 = vmatprep.subr.bf16.mxu0 %v3015_v15  ;;  %v3831_v36 = vpop.permute.xlu0 %3286  ;;  %v2997_v41 = vpack.c.bf16 %v900_v28, %v895_v0  ;;  %v901_v13 = vsel %vm892_vm3, %v3279_v58, %v3233_v61  ;;  %773 = vmatprep.mubr.f32.mxu1 %v3403_v22 }
  0xab   :  { %v3835_v44 = vpop.permute.xlu1 %3291  ;;  %v3289_v24 = vunpack.i.h.bf16 %v3831_v36  ;;  %v3288_v53 = vunpack.i.l.bf16 %v3831_v36  ;;  %v1484_v26 = vsel %vm1478_vm5, %v3284_v25, %v3273_v48  ;;  %v2995_v39 = vpack.c.bf16 %v901_v13, %v896_v1  ;;  %v3938_v1 = vld [vmem:[%s4124_s1 + $0x60] sm:$0xff] }
  0xac   :  { %v3294_v7 = vunpack.i.h.bf16 %v3835_v44  ;;  %v3293_v10 = vunpack.i.l.bf16 %v3835_v44  ;;  %2819 = vmatmul.mubr.msk.f32.gmra.mrb[4].mxu0 %vm101_vm0, %v3828_v6  ;;  %2805 = vmatmul.mubr.msk.f32.gmra.mrb[6].mxu1 %vm101_vm0, %v3679_v2  ;;  %v3017_v14 = vpack.c.bf16 %v1484_v26, %v1479_v35  ;;  %v3950_v26 = vld [vmem:[%s4124_s1 + $0x68] sm:$0xff] }
  0xad   :  { %2924 = vmatprep.mubr.msk.f32.mxu0 %vm101_vm0, %v3802_v49  ;;  %v1483_v51 = vsel %vm1478_vm5, %v3288_v53, %v3289_v24  ;;  %2996 = vmatprep.subr.bf16.mxu1 %v2995_v39 }
  0xae   :  { %v3297_v61 = vpop.permute.xlu0 %3296  ;;  %v1488_v11 = vsel %vm1478_vm5, %v3293_v10, %v3294_v7  ;;  %2998 = vmatpush1.bf16.msra.mxu1 %v2997_v41  ;;  %1060 = vmatprep.mubr.f32.mxu1 %v3403_v22 }
  0xaf   :  { %v3858_v18 = vpop.permute.xlu1 %3301  ;;  %v3299_v20 = vunpack.i.h.bf16 %v3297_v61  ;;  %v3298_v21 = vunpack.i.l.bf16 %v3297_v61  ;;  %v3023_v4 = vpack.c.bf16 %v1488_v11, %v1483_v51 }
  0xb0   :  { %v3304_v9 = vunpack.i.h.bf16 %v3858_v18  ;;  %v3303_v27 = vunpack.i.l.bf16 %v3858_v18  ;;  %2925 = vmatmul.mubr.msk.f32.vlgmr.msra.gmra.mrb[0].mxu0 %vm101_vm0, %v3828_v6 }
  0xb1   :  { %v1193_v2 = vsel %vm1185_vm4, %v3244_v3, %v3299_v20  ;;  %v1188_v32 = vsel %vm1185_vm4, %v3239_v63, %v3298_v21  ;;  %3018 = vmatpush1.bf16.msra.mxu0 %v3017_v14  ;;  %1569 = vmatprep.mubr.f32.mxu0 %v3403_v22  ;;  %v1189_v37 = vsel %vm1185_vm4, %v3298_v21, %v3258_v46 }
  0xb2   :  { %v3009_v55 = vpack.c.bf16 %v1193_v2, %v1188_v32  ;;  %3024 = vmatprep.subr.bf16.mxu0 %v3023_v4  ;;  %v3880_v62 = vpop.permute.xlu0 %3306  ;;  %2812 = vmatmul.mubr.msk.f32.vlgmr.msra.gmra.mrb[4].mxu1 %vm101_vm0, %v3730_v12  ;;  %v1194_v16 = vsel %vm1185_vm4, %v3299_v20, %v3263_v33  ;;  %v1773_v59 = vsel %vm1771_vm6, %v3303_v27, %v3304_v9  ;;  %v3898_v12 = vld [vmem:[%s4124_s1 + $0x58] sm:$0xff] }
  0xb3   :  { %v3312_v63 = vpop.permute.xlu1 %3311  ;;  %v3309_v3 = vunpack.i.h.bf16 %v3880_v62  ;;  %v3308_v29 = vunpack.i.l.bf16 %v3880_v62  ;;  %v3007_v46 = vpack.c.bf16 %v1194_v16, %v1189_v37  ;;  %1066 = vmatprep.mubr.f32.mxu1 %v3403_v22 }
  0xb4   :  { %v3314_v38 = vunpack.i.h.bf16 %v3312_v63  ;;  %v3313_v40 = vunpack.i.l.bf16 %v3312_v63  ;;  %2826 = vmatmul.mubr.msk.f32.vlgmr.msra.gmra.mrb[2].mxu0 %vm101_vm0, %v3878_v50 }
  0xb5   :  { %3008 = vmatprep.subr.bf16.mxu1 %v3007_v46  ;;  %3026 = vmatpush3.bf16.msra.mxu0 %v3023_v4  ;;  %v1778_v34 = vsel %vm1771_vm6, %v3308_v29, %v3309_v3  ;;  %v2840_v46 = vld [vmem:[%s4124_s1 + $0x70] sm:$0xff] }
  0xb6   :  { %3010 = vmatpush1.bf16.msra.mxu1 %v3009_v55  ;;  %v3317_v33 = vpop.permute.xlu0 %3316  ;;  %1575 = vmatprep.mubr.f32.mxu0 %v3403_v22  ;;  %v3027_v5 = vpack.c.bf16 %v1778_v34, %v1773_v59  ;;  %v1772_v31 = vsel %vm1771_vm6, %v3313_v40, %v3303_v27  ;;  %v1777_v30 = vsel %vm1771_vm6, %v3314_v38, %v3308_v29 }
  0xb7   :  { %v3322_v43 = vpop.permute.xlu1 %3321  ;;  %v3319_v45 = vunpack.i.h.bf16 %v3317_v33  ;;  %v3318_v48 = vunpack.i.l.bf16 %v3317_v33  ;;  %2813 = vmatmul.mubr.msk.f32.gmra.mrb[6].mxu1 %vm101_vm0, %v3750_v23  ;;  %v3029_v58 = vpack.c.bf16 %v1777_v30, %v1772_v31 }
  0xb8   :  { %v3324_v8 = vunpack.i.h.bf16 %v3322_v43  ;;  %v3323_v19 = vunpack.i.l.bf16 %v3322_v43  ;;  %2827 = vmatmul.mubr.msk.f32.gmra.mrb[4].mxu0 %vm101_vm0, %v3898_v12  ;;  %3028 = vmatprep.subr.bf16.mxu0 %v3027_v5 }
  0xb9   :  { %v1486_v52 = vsel %vm1478_vm5, %v3274_v47, %v3319_v45  ;;  %v1481_v56 = vsel %vm1478_vm5, %v3269_v42, %v3318_v48  ;;  %1353 = vmatprep.mubr.f32.mxu1 %v3403_v22  ;;  %2931 = vmatprep.mubr.msk.f32.mxu0 %vm101_vm0, %v3878_v50  ;;  %v1482_v23 = vsel %vm1478_vm5, %v3318_v48, %v3288_v53 }
  0xba   :  { %v3021_v60 = vpack.c.bf16 %v1486_v52, %v1481_v56  ;;  %v3327_v15 = vpop.permute.xlu0 %3326  ;;  %v1487_v57 = vsel %vm1478_vm5, %v3319_v45, %v3293_v10  ;;  %v1776_v54 = vsel %vm1771_vm6, %v3323_v19, %v3324_v8  ;;  %v2841_v56 = vld [vmem:[%s4124_s1 + $0x78] sm:$0xff] }
  0xbb   :  { %v3925_v47 = vpop.permute.xlu1 %3331  ;;  %v3329_v17 = vunpack.i.h.bf16 %v3327_v15  ;;  %v3328_v42 = vunpack.i.l.bf16 %v3327_v15  ;;  %2820 = vmatmul.mubr.msk.f32.vlgmr.msra.gmra.mrb[4].mxu1 %vm101_vm0, %v3802_v49  ;;  %v3019_v25 = vpack.c.bf16 %v1487_v57, %v1482_v23 }
  0xbc   :  { %2932 = vmatmul.mubr.msk.f32.vlgmr.msra.gmra.mrb[0].mxu0 %vm101_vm0, %v3898_v12  ;;  %1359 = vmatprep.mubr.f32.mxu1 %v3403_v22  ;;  %v3334_v0 = vunpack.i.h.bf16 %v3925_v47  ;;  %v3333_v28 = vunpack.i.l.bf16 %v3925_v47 }
  0xbd   :  { %3020 = vmatprep.subr.bf16.mxu1 %v3019_v25  ;;  %3030 = vmatpush1.bf16.msra.mxu0 %v3029_v58  ;;  %v1781_v49 = vsel %vm1771_vm6, %v3328_v42, %v3329_v17 }
  0xbe   :  { %3022 = vmatpush1.bf16.msra.mxu1 %v3021_v60  ;;  %v3337_v35 = vpop.permute.xlu0 %3336  ;;  %1862 = vmatprep.mubr.f32.mxu0 %v3403_v22  ;;  %v3035_v36 = vpack.c.bf16 %v1781_v49, %v1776_v54  ;;  %v2066_v7 = vsel %vm2064_vm7, %v3333_v28, %v3334_v0 }
  0xbf   :  { %v3342_v41 = vpop.permute.xlu1 %3341  ;;  %v3339_v44 = vunpack.i.h.bf16 %v3337_v35  ;;  %v3338_v24 = vunpack.i.l.bf16 %v3337_v35  ;;  %2821 = vmatmul.mubr.msk.f32.gmra.mrb[6].mxu1 %vm101_vm0, %v3828_v6 }
  0xc0   :  { %v3344_v53 = vunpack.i.h.bf16 %v3342_v41  ;;  %v3343_v13 = vunpack.i.l.bf16 %v3342_v41  ;;  %2834 = vmatmul.mubr.msk.f32.vlgmr.msra.gmra.mrb[2].mxu0 %vm101_vm0, %v3938_v1  ;;  %3036 = vmatprep.subr.bf16.mxu0 %v3035_v36 }
  0xc1   :  { %3038 = vmatpush3.bf16.msra.mxu0 %v3035_v36  ;;  %1646 = vmatprep.mubr.f32.mxu1 %v3403_v22  ;;  %v2071_v6 = vsel %vm2064_vm7, %v3338_v24, %v3339_v44 }
  0xc2   :  { %v1774_v10 = vsel %vm1771_vm6, %v3304_v9, %v3343_v13  ;;  %v1779_v39 = vsel %vm1771_vm6, %v3309_v3, %v3344_v53  ;;  %v3347_v51 = vpop.permute.xlu0 %3346  ;;  %1868 = vmatprep.mubr.f32.mxu0 %v3403_v22  ;;  %v1775_v61 = vsel %vm1771_vm6, %v3343_v13, %v3323_v19  ;;  %v1780_v11 = vsel %vm1771_vm6, %v3344_v53, %v3328_v42 }
  0xc3   :  { %v3033_v14 = vpack.c.bf16 %v1779_v39, %v1774_v10  ;;  %v3352_v20 = vpop.permute.xlu1 %3351  ;;  %v3349_v21 = vunpack.i.h.bf16 %v3347_v51  ;;  %v3348_v4 = vunpack.i.l.bf16 %v3347_v51  ;;  %2828 = vmatmul.mubr.msk.f32.vlgmr.msra.gmra.mrb[4].mxu1 %vm101_vm0, %v3878_v50  ;;  %v3031_v18 = vpack.c.bf16 %v1780_v11, %v1775_v61  ;;  %v2849_v11 = vld [vmem:[%s4124_s1 + $0x88] sm:$0xff] }
  0xc4   :  { %2835 = vmatmul.mubr.msk.f32.gmra.mrb[4].mxu0 %vm101_vm0, %v3950_v26  ;;  %v3039_v9 = vpack.c.bf16 %v2071_v6, %v2066_v7  ;;  %1652 = vmatprep.mubr.f32.mxu1 %v3403_v22  ;;  %v3354_v27 = vunpack.i.h.bf16 %v3352_v20  ;;  %v3353_v2 = vunpack.i.l.bf16 %v3352_v20 }
  0xc5   :  { %v2065_v32 = vsel %vm2064_vm7, %v3348_v4, %v3333_v28  ;;  %v2070_v37 = vsel %vm2064_vm7, %v3349_v21, %v3338_v24  ;;  %3032 = vmatprep.subr.bf16.mxu1 %v3031_v18  ;;  %2938 = vmatprep.mubr.msk.f32.mxu0 %vm101_vm0, %v3938_v1  ;;  %v2625_v18 = vlaneseq }
  0xc6   :  { %v3041_v55 = vpack.c.bf16 %v2070_v37, %v2065_v32  ;;  %3040 = vmatprep.subr.bf16.mxu0 %v3039_v9  ;;  %3034 = vmatpush1.bf16.msra.mxu1 %v3033_v14  ;;  %v3357_v50 = vpop.permute.xlu0 %3356  ;;  %v2069_v59 = vsel %vm2064_vm7, %v3353_v2, %v3354_v27 }
  0xc7   :  { %v3362_v62 = vpop.permute.xlu1 %3361  ;;  %v3359_v16 = vunpack.i.h.bf16 %v3357_v50  ;;  %v3358_v63 = vunpack.i.l.bf16 %v3357_v50  ;;  %2829 = vmatmul.mubr.msk.f32.gmra.mrb[6].mxu1 %vm101_vm0, %v3898_v12  ;;  %v2626_v9 = vshrl.u32 %v2625_v18, 7 }
  0xc8   :  { %v3364_v3 = vunpack.i.h.bf16 %v3362_v62  ;;  %v3363_v29 = vunpack.i.l.bf16 %v3362_v62  ;;  %2939 = vmatmul.mubr.msk.f32.vlgmr.msra.gmra.mrb[0].mxu0 %vm101_vm0, %v3950_v26  ;;  %1939 = vmatprep.mubr.f32.mxu1 %v3403_v22 }
  0xc9   :  { %3042 = vmatpush1.bf16.msra.mxu0 %v3041_v55  ;;  %2155 = vmatprep.mubr.f32.mxu0 %v3403_v22  ;;  %v2074_v38 = vsel %vm2064_vm7, %v3358_v63, %v3359_v16  ;;  %v2627_v27 = vsub.s32 0, %v2626_v9  ;;  %v2631_v32 = vsub.s32 1, %v2626_v9  ;;  %v2635_v37 = vsub.s32 2, %v2626_v9 }
  0xca   :  { %v2067_v40 = vsel %vm2064_vm7, %v3334_v0, %v3363_v29  ;;  %v2072_v12 = vsel %vm2064_vm7, %v3339_v44, %v3364_v3  ;;  %v3367_v34 = vpop.permute.xlu0 %3366  ;;  %v2068_v33 = vsel %vm2064_vm7, %v3363_v29, %v3353_v2  ;;  %v2073_v5 = vsel %vm2064_vm7, %v3364_v3, %v3358_v63  ;;  %v2623_v2 = vld [vmem:[%s4125_s3] sm:$0x1f] }
  0xcb   :  { %v3045_v31 = vpack.c.bf16 %v2072_v12, %v2067_v40  ;;  %v3372_v30 = vpop.permute.xlu1 %3371  ;;  %v3369_v43 = vunpack.i.h.bf16 %v3367_v34  ;;  %v3368_v45 = vunpack.i.l.bf16 %v3367_v34  ;;  %2836 = vmatmul.mubr.msk.f32.vlgmr.msra.gmra.mrb[4].mxu1 %vm101_vm0, %v3938_v1  ;;  %v3043_v48 = vpack.c.bf16 %v2073_v5, %v2068_v33 }
  0xcc   :  { %v3374_v8 = vunpack.i.h.bf16 %v3372_v30  ;;  %v3373_v19 = vunpack.i.l.bf16 %v3372_v30  ;;  %2842 = vmatmul.mubr.msk.f32.vlgmr.msra.gmra.mrb[2].mxu0 %vm101_vm0, %v2840_v46  ;;  %v3047_v52 = vpack.c.bf16 %v2074_v38, %v2069_v59  ;;  %1945 = vmatprep.mubr.f32.mxu1 %v3403_v22  ;;  %v2639_v55 = vsub.s32 3, %v2626_v9 }
  0xcd   :  { %3044 = vmatprep.subr.bf16.mxu1 %v3043_v48  ;;  %2161 = vmatprep.mubr.f32.mxu0 %v3403_v22  ;;  %v2359_v23 = vsel %vm2357_vm8, %v3368_v45, %v3369_v43  ;;  %v2632_v62 = vrot.slane %v2623_v2, %v2631_v32  ;;  %v2636_v3 = vrot.slane %v2623_v2, %v2635_v37 }
  0xce   :  { %3048 = vmatprep.subr.bf16.mxu0 %v3047_v52  ;;  %3046 = vmatpush1.bf16.msra.mxu1 %v3045_v31  ;;  %v3377_v58 = vpop.permute.xlu0 %3376  ;;  %v2364_v60 = vsel %vm2357_vm8, %v3373_v19, %v3374_v8  ;;  %v2640_v38 = vrot.slane %v2623_v2, %v2639_v55 }
  0xcf   :  { %3050 = vmatpush3.bf16.msra.mxu0 %v3047_v52  ;;  %v3382_v15 = vpop.permute.xlu1 %3381  ;;  %v3379_v57 = vunpack.i.h.bf16 %v3377_v58  ;;  %v3378_v47 = vunpack.i.l.bf16 %v3377_v58  ;;  %2837 = vmatmul.mubr.msk.f32.gmra.mrb[6].mxu1 %vm101_vm0, %v3950_v26  ;;  %v3051_v17 = vpack.c.bf16 %v2364_v60, %v2359_v23  ;;  %v2848_v26 = vld [vmem:[%s4124_s1 + $0x80] sm:$0xff] }
  0xd0   :  { %v3384_v42 = vunpack.i.h.bf16 %v3382_v15  ;;  %2843 = vmatmul.mubr.msk.f32.gmra.mrb[4].mxu0 %vm101_vm0, %v2841_v56  ;;  %2232 = vmatprep.mubr.f32.mxu1 %v3403_v22  ;;  %v3383_v25 = vunpack.i.l.bf16 %v3382_v15 }
  0xd1   :  { %v2363_v54 = vsel %vm2357_vm8, %v3379_v57, %v3373_v19  ;;  %v2358_v0 = vsel %vm2357_vm8, %v3378_v47, %v3368_v45  ;;  %3052 = vmatprep.subr.bf16.mxu0 %v3051_v17  ;;  %2945 = vmatprep.mubr.msk.f32.mxu0 %vm101_vm0, %v2840_v46 }
  0xd2   :  { %v3053_v28 = vpack.c.bf16 %v2363_v54, %v2358_v0  ;;  %v3387_v1 = vpop.permute.xlu0 %3386  ;;  %v2361_v41 = vsel %vm2357_vm8, %v3383_v25, %v3384_v42  ;;  %v2360_v53 = vsel %vm2357_vm8, %v3369_v43, %v3383_v25 }
  0xd3   :  { %v3392_v49 = vpop.permute.xlu1 %3391  ;;  %v3389_v35 = vunpack.i.h.bf16 %v3387_v1  ;;  %v3388_v36 = vunpack.i.l.bf16 %v3387_v1  ;;  %2844 = vmatmul.mubr.msk.f32.vlgmr.msra.gmra.mrb[4].mxu1 %vm101_vm0, %v2840_v46  ;;  %v2643_v46 = vsub.s32 4, %v2626_v9 }
  0xd4   :  { %v3394_v44 = vunpack.i.h.bf16 %v3392_v49  ;;  %v3393_v24 = vunpack.i.l.bf16 %v3392_v49  ;;  %2946 = vmatmul.mubr.msk.f32.vlgmr.msra.gmra.mrb[0].mxu0 %vm101_vm0, %v2841_v56  ;;  %2238 = vmatprep.mubr.f32.mxu1 %v3403_v22 }
  0xd5   :  { %v2365_v13 = vsel %vm2357_vm8, %v3374_v8, %v3388_v36  ;;  %3054 = vmatpush1.bf16.msra.mxu0 %v3053_v28  ;;  %2448 = vmatprep.mubr.f32.mxu0 %v3403_v22  ;;  %v2366_v7 = vsel %vm2357_vm8, %v3388_v36, %v3389_v35  ;;  %v2644_v19 = vrot.slane %v2623_v2, %v2643_v46 }
  0xd6   :  { %v3057_v6 = vpack.c.bf16 %v2365_v13, %v2360_v53  ;;  %v3055_v10 = vpack.c.bf16 %v2366_v7, %v2361_v41  ;;  %v2362_v39 = vsel %vm2357_vm8, %v3384_v42, %v3393_v24  ;;  %v2367_v51 = vsel %vm2357_vm8, %v3389_v35, %v3394_v44 }
  0xd7   :  { %2845 = vmatmul.mubr.msk.f32.gmra.mrb[6].mxu1 %vm101_vm0, %v2841_v56  ;;  %v3059_v61 = vpack.c.bf16 %v2367_v51, %v2362_v39 }
  0xd8   :  { %2850 = vmatmul.mubr.msk.f32.vlgmr.msra.gmra.mrb[2].mxu0 %vm101_vm0, %v2848_v26  ;;  %3056 = vmatprep.subr.bf16.mxu1 %v3055_v10 }
  0xd9   :  { %3060 = vmatprep.subr.bf16.mxu0 %v3059_v61  ;;  %3058 = vmatpush1.bf16.msra.mxu1 %v3057_v6 }
  0xda   :  { %3062 = vmatpush3.bf16.msra.mxu0 %v3059_v61  ;;  %2454 = vmatprep.mubr.f32.mxu0 %v3403_v22 }
  0xdb   :  { %2525 = vmatprep.mubr.f32.mxu1 %v3403_v22 }
  0xdc   :  { %2851 = vmatmul.mubr.msk.f32.gmra.mrb[4].mxu0 %vm101_vm0, %v2849_v11  ;;  %2852 = vmatmul.mubr.msk.f32.vlgmr.msra.gmra.mrb[4].mxu1 %vm101_vm0, %v2848_v26 }
  0xdd   :  { %2531 = vmatprep.mubr.f32.mxu1 %v3403_v22  ;;  %2952 = vmatprep.mubr.msk.f32.mxu0 %vm101_vm0, %v2848_v26  ;;  %v2628_v22 = vrot.slane %v2623_v2, %v2627_v27 }
  0xe0   :  { %2853 = vmatmul.mubr.msk.f32.gmra.mrb[6].mxu1 %vm101_vm0, %v2849_v11  ;;  %2953 = vmatmul.mubr.msk.f32.vlgmr.msra.gmra.mrb[0].mxu0 %vm101_vm0, %v2849_v11 }
 0x16b   :  { %v409_v14 = vpop.f32.mrb[0].mxu1 }
 0x16c   :  { %v411_v20 = vpop.f32.mrb[1].mxu1 }
 0x16f   :  { %v415_v21 = vpop.f32.mrb[2].mxu1 }
 0x170   :  { %v417_v4 = vpop.f32.mrb[3].mxu1 }
 0x1ab   :  { %v2450_v50 = vpop.f32.mrb[2].mxu0 }
 0x1ac   :  { %v4037_v16 = vadd.f32 %v2450_v50, %v409_v14  ;;  %v2452_v63 = vpop.f32.mrb[3].mxu0 }
 0x1ad   :  { %v4039_v29 = vadd.f32 %v2452_v63, %v411_v20 }
 0x1ae   :  { %v2650_v59 = vmul.f32 %v4037_v16, %v2628_v22 }
 0x1af   :  { %v2651_v40 = vmul.f32 %v4039_v29, %v2632_v62  ;;  %v2456_v12 = vpop.f32.mrb[4].mxu0  ;;  %v4043_v34 = vpop.f32.mrb[4].mxu1 }
 0x1b0   :  { %v2672_v33 = vmul.f32 %v4037_v16, %v2650_v59  ;;  %v4046_v5 = vadd.f32 %v2456_v12, %v415_v21  ;;  %v2652_v31 = vmul.f32 %v2636_v3, %v4043_v34  ;;  %v2458_v30 = vpop.f32.mrb[5].mxu0  ;;  %v4049_v43 = vpop.f32.mrb[5].mxu1 }
 0x1b1   :  { %v2660_v45 = vadd.f32 %v2651_v40, %v2650_v59  ;;  %v2673_v48 = vmul.f32 %v4039_v29, %v2651_v40  ;;  %v4052_v8 = vadd.f32 %v2458_v30, %v417_v4  ;;  %v2653_v23 = vmul.f32 %v2640_v38, %v4049_v43  ;;  %v2702_v40 = vld [vmem:[%s4126_s2] sm:$0xff] }
 0x1b2   :  { %v2655_v52 = vmul.f32 %v4046_v5, %v2628_v22  ;;  %v2674_v56 = vmul.f32 %v2652_v31, %v4043_v34  ;;  %v3411_v4 = vmov 0  }
 0x1b3   :  { %v2682_v58 = vadd.f32 %v2673_v48, %v2672_v33  ;;  %v2656_v60 = vmul.f32 %v4052_v8, %v2632_v62  ;;  %v4058_v15 = vpop.f32.mrb[6].mxu1  ;;  %v4060_v57 = vpop.f32.mrb[0].mxu0  ;;  %v2661_v47 = vadd.f32 %v2660_v45, %v2652_v31  ;;  %v2675_v35 = vmul.f32 %v2653_v23, %v4049_v43  ;;  %3395 = vset.pattern.permute.xlu1 %v3411_v4  ;;  %v2703_v31 = vld [vmem:[%s4126_s2 + $0x8] sm:$0xff] }
 0x1b4   :  { %v2677_v17 = vmul.f32 %v4046_v5, %v2655_v52  ;;  %v2657_v42 = vmul.f32 %v2636_v3, %v4058_v15  ;;  %v4064_v25 = vpop.f32.mrb[7].mxu1  ;;  %v4066_v54 = vpop.f32.mrb[1].mxu0  ;;  %v2659_v13 = vmul.f32 %v4060_v57, %v2644_v19 }
 0x1b5   :  { %v2666_v0 = vadd.f32 %v2656_v60, %v2655_v52  ;;  %v2678_v28 = vmul.f32 %v4052_v8, %v2656_v60  ;;  %v2658_v1 = vmul.f32 %v2640_v38, %v4064_v25  ;;  %v2654_v49 = vmul.f32 %v2644_v19, %v4066_v54 }
 0x1b6   :  { %v2679_v36 = vmul.f32 %v2657_v42, %v4058_v15  ;;  %v2662_v41 = vadd.f32 %v2661_v47, %v2653_v23  ;;  %v2683_v44 = vadd.f32 %v2682_v58, %v2674_v56  ;;  %v2681_v14 = vmul.f32 %v4060_v57, %v2659_v13 }
 0x1b7   :  { %v2688_v24 = vadd.f32 %v2678_v28, %v2677_v17  ;;  %v2676_v53 = vmul.f32 %v2654_v49, %v4066_v54  ;;  %v2667_v26 = vadd.f32 %v2666_v0, %v2657_v42  ;;  %v2680_v10 = vmul.f32 %v2658_v1, %v4064_v25 }
 0x1b8   :  { %v2663_v7 = vadd.f32 %v2662_v41, %v2654_v49  ;;  %v2684_v6 = vadd.f32 %v2683_v44, %v2675_v35  ;;  %v3412_v38 = vmov 1  }
 0x1b9   :  { %v2668_v39 = vadd.f32 %v2667_v26, %v2658_v1  ;;  %v2689_v51 = vadd.f32 %v2688_v24, %v2679_v36  ;;  %3396 = vset.pattern.permute.xlu0 %v3412_v38 }
 0x1ba   :  { %2664 = vadd.xlane.f32.xlu0 %v2663_v7  ;;  %v2685_v61 = vadd.f32 %v2684_v6, %v2676_v53 }
 0x1bb   :  { %v2669_v11 = vadd.f32 %v2668_v39, %v2659_v13  ;;  %v2690_v20 = vadd.f32 %v2689_v51, %v2680_v10 }
 0x1bd   :  { %2670 = vadd.xlane.f32.xlu1 %v2669_v11  ;;  %v2691_v21 = vadd.f32 %v2690_v20, %v2681_v14 }
 0x1be   :  { %2686 = vadd.xlane.f32.xlu0 %v2685_v61 }
 0x1c2   :  { %2692 = vadd.xlane.f32.xlu0 %v2691_v21 }
 0x247   :  { %v2665_v18 = vpop.xlane.xlu0 %2664 }
 0x248   :  { %v2694_v9 = vmul.f32 0.002232143, %v2665_v18 }
 0x24a   :  { %v2671_v27 = vpop.xlane.xlu1 %2670  ;;  %v2698_v32 = vmul.f32 %v2694_v9, %v2694_v9 }
 0x24b   :  { %v2687_v2 = vpop.xlane.xlu0 %2686  ;;  %v2695_v22 = vmul.f32 0.002232143, %v2671_v27 }
 0x24c   :  { %v2696_v37 = vmul.f32 0.002232143, %v2687_v2 }
 0x24d   :  { %v2699_v63 = vmul.f32 %v2695_v22, %v2695_v22 }
 0x24e   :  { %v2700_v55 = vsub.f32 %v2696_v37, %v2698_v32 }
 0x24f   :  { %v2693_v50 = vpop.xlane.xlu0 %2692 }
 0x250   :  { %v2704_v62 = vadd.f32 1e-05, %v2700_v55  ;;  %v2697_v3 = vmul.f32 0.002232143, %v2693_v50 }
 0x252   :  { %3398 = vrsqrt.f32 %v2704_v62  ;;  %v2701_v46 = vsub.f32 %v2697_v3, %v2699_v63 }
 0x254   :  { %v2705_v59 = vadd.f32 1e-05, %v2701_v46 }
 0x256   :  { %3400 = vrsqrt.f32 %v2705_v59 }
 0x25c   :  { %v3399_v12 = vpop.eup %3398 }
 0x25d   :  { %v2708_v33 = vmul.f32 %v3399_v12, %v2702_v40 }
 0x25f   :  { %v2710_v30 = vmul.f32 %v2708_v33, %v2694_v9 }
 0x260   :  { %v3401_v45 = vpop.eup %3400 }
 0x261   :  { %2714 = vrot.lane.b32.xlu1 %v2710_v30, %s3413_s7  ;;  %v2709_v48 = vmul.f32 %v3401_v45, %v2703_v31 }
 0x263   :  { %v2711_v19 = vmul.f32 %v2709_v48, %v2695_v22 }
 0x265   :  { %2724 = vperm.xlu1 %3395, %v2708_v33   ;;  %2716 = vrot.lane.b32.xlu0 %v2711_v19, %s3413_s7 }
 0x269   :  { %2729 = vperm.xlu1 %3395, %v2709_v48  }
 0x26d   :  { %3397 = vset.pattern.permute.xlu1 %v3412_v38 }
 0x2d3   :  { %v2715_v52 = vpop.permute.xlu1 %2714 }
 0x2d4   :  { %v2720_v56 = vsub.f32 %v2702_v40, %v2715_v52 }
 0x2d6   :  { %2744 = vperm.xlu0 %3396, %v2720_v56  }
 0x2d7   :  { %v2717_v23 = vpop.permute.xlu0 %2716 }
 0x2d8   :  { %v2721_v58 = vsub.f32 %v2703_v31, %v2717_v23 }
 0x2da   :  { %2749 = vperm.xlu1 %3397, %v2721_v58  }
 0x2e4   :  { %v2725_v60 = vpop.permute.xlu1 %2724 }
 0x2e5   :  { %v2732_v17 = vmul.f32 %v4037_v16, %v2725_v60  ;;  %v2733_v42 = vmul.f32 %v4039_v29, %v2725_v60  ;;  %v2734_v0 = vmul.f32 %v2725_v60, %v4043_v34  ;;  %v2735_v28 = vmul.f32 %v2725_v60, %v4049_v43 }
 0x2e6   :  { %v2736_v49 = vmul.f32 %v2725_v60, %v4066_v54 }
 0x2e8   :  { %v2730_v47 = vpop.permute.xlu1 %2729 }
 0x2e9   :  { %v2737_v35 = vmul.f32 %v4046_v5, %v2730_v47  ;;  %v2738_v13 = vmul.f32 %v4052_v8, %v2730_v47  ;;  %v2739_v16 = vmul.f32 %v2730_v47, %v4058_v15  ;;  %v2740_v29 = vmul.f32 %v2730_v47, %v4064_v25 }
 0x2ea   :  { %v2741_v54 = vmul.f32 %v4060_v57, %v2730_v47 }
 0x355   :  { %v2745_v1 = vpop.permute.xlu0 %2744 }
 0x356   :  { %v2752_v36 = vadd.f32 %v2745_v1, %v2732_v17  ;;  %v2753_v41 = vadd.f32 %v2745_v1, %v2733_v42  ;;  %v2754_v44 = vadd.f32 %v2745_v1, %v2734_v0  ;;  %v2755_v24 = vadd.f32 %v2745_v1, %v2735_v28 }
 0x357   :  { %v2756_v53 = vadd.f32 %v2745_v1, %v2736_v49 }
 0x358   :  { %v2762_v26 = vmax.f32 %v2752_v36, 0.0  ;;  %v2763_v34 = vmax.f32 %v2753_v41, 0.0  ;;  %v2764_v7 = vmax.f32 %v2754_v44, 0.0  ;;  %v2765_v43 = vmax.f32 %v2755_v24, 0.0 }
 0x359   :  { %v2766_v6 = vmax.f32 %v2756_v53, 0.0  ;;  %v2750_v10 = vpop.permute.xlu1 %2749 }
 0x35a   :  { %2772 = vst [vmem:[%s4127_s4] sm:$0xff] %v2762_v26  ;;  %2773 = vst [vmem:[%s4127_s4 + $0x8] sm:$0xff] %v2763_v34  ;;  %v2757_v5 = vadd.f32 %v2750_v10, %v2737_v35  ;;  %v2758_v8 = vadd.f32 %v2750_v10, %v2738_v13  ;;  %v2759_v15 = vadd.f32 %v2750_v10, %v2739_v16 }
 0x35b   :  { %2774 = vst [vmem:[%s4127_s4 + $0x10] sm:$0xff] %v2764_v7  ;;  %2775 = vst [vmem:[%s4127_s4 + $0x18] sm:$0xff] %v2765_v43  ;;  %v2760_v57 = vadd.f32 %v2750_v10, %v2740_v29  ;;  %v2761_v25 = vadd.f32 %v2750_v10, %v2741_v54 }
 0x35c   :  { %2776 = vst [vmem:[%s4127_s4 + $0x20] sm:$0xff] %v2766_v6  ;;  %v2767_v39 = vmax.f32 %v2757_v5, 0.0  ;;  %v2768_v51 = vmax.f32 %v2758_v8, 0.0  ;;  %v2769_v61 = vmax.f32 %v2759_v15, 0.0 }
 0x35d   :  { %v2770_v11 = vmax.f32 %v2760_v57, 0.0  ;;  %v2771_v14 = vmax.f32 %v2761_v25, 0.0 }
 0x35e   :  { %2777 = vst [vmem:[%s4127_s4 + $0x28] sm:$0xff] %v2767_v39  ;;  %2778 = vst [vmem:[%s4127_s4 + $0x30] sm:$0xff] %v2768_v51 }
 0x35f   :  { %2779 = vst [vmem:[%s4127_s4 + $0x38] sm:$0xff] %v2769_v61  ;;  %2780 = vst [vmem:[%s4127_s4 + $0x40] sm:$0xff] %v2770_v11 }
 0x360   :  { %2781 = vst [vmem:[%s4127_s4 + $0x48] sm:$0xff] %v2771_v14 }

</bundles_post_ra>
